<compile_context>
chip_gen: v7x
topology: tpu7x:2x2x1
jax: 0.10.0
libtpu: 0.0.40
codegen_flags: <defaults>
</compile_context>

<pallas_src>
import functools

import jax
import jax.numpy as jnp
from jax import lax
from jax.experimental import pallas as pl
from jax.experimental.pallas import tpu as pltpu


def _round_up(x, m):
    return (x + m - 1) // m * m


# ---------------------------------------------------------------------------
# Encoder kernel: batched (x @ W) -> masked mean pool -> + bias -> L2 norm
# One grid step handles a tile of TB samples: all TB*N token rows go through
# the MXU in a single matmul instead of one tiny matmul per batch row.
# ---------------------------------------------------------------------------
def _encoder_kernel(x_ref, pool_ref, w_ref, b_ref, out_ref):
    TB, N, D_in = x_ref.shape
    E = out_ref.shape[-1]

    # One large MXU matmul over all tokens in the tile (bf16 in, f32 accumulate).
    x2 = x_ref[...].reshape(TB * N, D_in)
    proj = jnp.dot(x2, w_ref[...], preferred_element_type=jnp.float32)  # (TB*N, E)
    proj = proj.reshape(TB, N, E)

    # Length-masked mean pool: pool_ref[b, n] = 1/len_b for n < len_b, else 0.
    pooled = jnp.sum(pool_ref[...][:, :, None] * proj, axis=1)          # (TB, E)
    # pool rows sum to 1 for valid samples, so the bias is added exactly once.
    mean = pooled + b_ref[...]

    # L2 normalize with rsqrt (EUP) instead of sqrt + divide (VALU).
    inv_norm = lax.rsqrt(jnp.sum(mean * mean, axis=-1, keepdims=True) + 1e-8)
    out_ref[...] = (mean * inv_norm).astype(out_ref.dtype)


def encode(features, lengths, weight, bias, *, tile_b=None):
    """features: [B, N, D_in]; lengths: [B] int32; weight: [D_in, E]; bias: [1, E]."""
    B, N, D_in = features.shape
    E = weight.shape[1]

    # TPU-friendly padding: batch -> mult of 8 (sublane), tokens -> mult of 8,
    # embedding -> mult of 128 (lane-dense output stores).
    E_pad = _round_up(E, 128)
    N_pad = _round_up(N, 8)
    B_pad = _round_up(B, 8)
    TB = tile_b if tile_b is not None else min(B_pad, 128)
    B_pad = _round_up(B_pad, TB)

    # bf16 MXU inputs (f32 accumulation happens inside the kernel).
    x = jnp.zeros((B_pad, N_pad, D_in), jnp.bfloat16).at[:B, :N, :].set(
        features.astype(jnp.bfloat16))
    w = jnp.zeros((D_in, E_pad), jnp.bfloat16).at[:, :E].set(
        weight.astype(jnp.bfloat16))
    b = jnp.zeros((1, E_pad), jnp.float32).at[:, :E].set(bias.astype(jnp.float32))

    # Pooling weights: 1/len for valid token positions, 0 for padded tokens/rows.
    lens = jnp.zeros((B_pad,), jnp.int32).at[:B].set(lengths.astype(jnp.int32))
    pos = jnp.arange(N_pad, dtype=jnp.int32)[None, :]
    inv_len = 1.0 / jnp.maximum(lens, 1).astype(jnp.float32)
    pool = jnp.where(pos < lens[:, None], inv_len[:, None], 0.0)  # (B_pad, N_pad) f32

    grid = (B_pad // TB,)
    out = pl.pallas_call(
        _encoder_kernel,
        out_shape=jax.ShapeDtypeStruct((B_pad, E_pad), jnp.float32),
        grid_spec=pltpu.PrefetchScalarGridSpec(
            num_scalar_prefetch=0,
            grid=grid,
            in_specs=[
                pl.BlockSpec((TB, N_pad, D_in), lambda bt: (bt, 0, 0)),
                pl.BlockSpec((TB, N_pad), lambda bt: (bt, 0)),
                pl.BlockSpec((D_in, E_pad), lambda bt: (0, 0)),   # resident weight
                pl.BlockSpec((1, E_pad), lambda bt: (0, 0)),      # resident bias
            ],
            out_specs=pl.BlockSpec((TB, E_pad), lambda bt: (bt, 0)),
        ),
        compiler_params=pltpu.CompilerParams(
            # Output tiles are independent -> shard across TensorCores (v7x).
            dimension_semantics=("parallel",)),
    )(x, pool, w, b)
    return out[:B, :E]


# ---------------------------------------------------------------------------
# TripletLoss kernel  (margin=0.2, max_violation=True)
# ---------------------------------------------------------------------------
def _triplet_kernel(img_ref, txt_ref, out_ref, *, margin, valid_b):
    img = img_ref[...]                                    # (B_pad, E_pad) f32
    txt = txt_ref[...]
    Bp = img.shape[0]

    scores = jnp.dot(img, txt.T, preferred_element_type=jnp.float32)  # (Bp, Bp)

    row = lax.broadcasted_iota(jnp.int32, (Bp, Bp), 0)
    col = lax.broadcasted_iota(jnp.int32, (Bp, Bp), 1)
    eye = row == col
    invalid = (row >= valid_b) | (col >= valid_b)         # padded rows/cols

    # Extract the diagonal once with a lane-direction (axis=1) reduce and reuse
    # its transpose for d2 (avoids a second full sublane-direction reduce).
    diag = jnp.sum(jnp.where(eye, scores, 0.0), axis=1, keepdims=True)  # (Bp, 1)

    cost_s = jnp.maximum(margin + scores - diag, 0.0)       # caption retrieval
    cost_im = jnp.maximum(margin + scores - diag.T, 0.0)    # image retrieval

    drop = eye | invalid
    cost_s = jnp.where(drop, 0.0, cost_s)
    cost_im = jnp.where(drop, 0.0, cost_im)

    # max_violation=True: hardest negative per row / per column.
    loss = jnp.sum(jnp.max(cost_s, axis=1)) + jnp.sum(jnp.max(cost_im, axis=0))
    out_ref[0, 0] = loss


def triplet_loss(img_emb, txt_emb, margin=0.2):
    B, E = img_emb.shape
    B_pad = _round_up(max(B, 8), 8)       # sublane-aligned MXU operands
    E_pad = _round_up(E, 128)             # lane-dense contraction dim
    img = jnp.zeros((B_pad, E_pad), jnp.float32).at[:B, :E].set(
        img_emb.astype(jnp.float32))
    txt = jnp.zeros((B_pad, E_pad), jnp.float32).at[:B, :E].set(
        txt_emb.astype(jnp.float32))

    out = pl.pallas_call(
        functools.partial(_triplet_kernel, margin=margin, valid_b=B),
        out_shape=jax.ShapeDtypeStruct((1, 1), jnp.float32),
        in_specs=[pl.BlockSpec(memory_space=pltpu.MemorySpace.VMEM),
                  pl.BlockSpec(memory_space=pltpu.MemorySpace.VMEM)],
        out_specs=pl.BlockSpec(memory_space=pltpu.MemorySpace.VMEM),
    )(img, txt)
    return out[0, 0]


# ---------------------------------------------------------------------------
# VSE wrapper
# ---------------------------------------------------------------------------
class VSEPallas:
    def __init__(self, d_img, d_txt, emb_dim, margin=0.2, seed=0):
        self.margin = margin
        k = jax.random.PRNGKey(seed)
        k_iw, k_ib, k_tw, k_tb = jax.random.split(k, 4)
        # deterministic synthetic encoder parameters
        self.img_w = jax.random.normal(k_iw, (d_img, emb_dim), jnp.float32) * 0.05
        self.img_b = jax.random.normal(k_ib, (1, emb_dim), jnp.float32) * 0.01
        self.txt_w = jax.random.normal(k_tw, (d_txt, emb_dim), jnp.float32) * 0.05
        self.txt_b = jax.random.normal(k_tb, (1, emb_dim), jnp.float32) * 0.01

    def forward(self, image, image_lengths, text, text_lengths):
        img_emb = encode(image, image_lengths, self.img_w, self.img_b)
        txt_emb = encode(text, text_lengths, self.txt_w, self.txt_b)
        return img_emb, txt_emb, text_lengths

    def triplet_loss(self, img, txt, txt_lengths):
        return triplet_loss(img, txt, self.margin), [1, 1]


if __name__ == "__main__":
    B, N_IMG, D_IMG = 4, 16, 32
    L_TXT, D_TXT, E = 8, 32, 32

    key = jax.random.PRNGKey(0)
    k_img, k_txt = jax.random.split(key, 2)

    image = jax.random.normal(k_img, (B, N_IMG, D_IMG), jnp.float32)
    text = jax.random.normal(k_txt, (B, L_TXT, D_TXT), jnp.float32)
    image_lengths = jnp.array([16, 12, 16, 10], dtype=jnp.int32)
    text_lengths = jnp.array([8, 5, 7, 8], dtype=jnp.int32)

    model = VSEPallas(D_IMG, D_TXT, E, margin=0.2, seed=0)

    img_emb, txt_emb, txt_lens = model.forward(
        image, image_lengths, text, text_lengths)
    loss, num_negs = model.triplet_loss(img_emb, txt_emb, txt_lens)

    jax.block_until_ready((img_emb, txt_emb, loss))

    assert img_emb.shape == (B, E) and txt_emb.shape == (B, E)
    assert txt_lens.shape == (B,)
    assert loss.shape == ()
    print("KERNEL_OK")
</pallas_src>

<mosaic_0001>
module attributes {stable_mosaic.version = 11 : i64} {
  func.func @_encoder_kernel(%arg0: i32, %arg1: memref<8x16x32xbf16, #tpu.memory_space<vmem>>, %arg2: memref<8x16xf32, #tpu.memory_space<vmem>>, %arg3: memref<32x128xbf16, #tpu.memory_space<vmem>>, %arg4: memref<1x128xf32, #tpu.memory_space<vmem>>, %arg5: memref<8x128xf32, #tpu.memory_space<vmem>>) attributes {dimension_semantics = [#tpu.dimension_semantics<parallel>], iteration_bounds = array<i64: 1>, scalar_prefetch = 0 : i64, scratch_operands = 0 : i64, tpu.core_type = #tpu.core_type<tc>, window_params = [{transform_indices = @transform_0, window_bounds = array<i64: 8, 16, 32>}, {transform_indices = @transform_1, window_bounds = array<i64: 8, 16>}, {pipeline_mode = #tpu.pipeline_mode<synchronous>, transform_indices = @transform_2, window_bounds = array<i64: 32, 128>}, {pipeline_mode = #tpu.pipeline_mode<synchronous>, transform_indices = @transform_3, window_bounds = array<i64: 1, 128>}, {transform_indices = @transform_4, window_bounds = array<i64: 8, 128>}]} {
    %c0 = arith.constant 0 : index
    %c0_0 = arith.constant 0 : index
    %c0_1 = arith.constant 0 : index
    %0 = vector.load %arg1[%c0, %c0_0, %c0_1] : memref<8x16x32xbf16, #tpu.memory_space<vmem>>, vector<8x16x32xbf16>
    %1 = vector.shape_cast %0 : vector<8x16x32xbf16> to vector<128x32xbf16>
    %c0_2 = arith.constant 0 : index
    %c0_3 = arith.constant 0 : index
    %2 = vector.load %arg3[%c0_2, %c0_3] : memref<32x128xbf16, #tpu.memory_space<vmem>>, vector<32x128xbf16>
    %cst = arith.constant dense<0.000000e+00> : vector<128x128xf32>
    %3 = tpu.matmul %1, %2, %cst {dimension_numbers = #tpu.dot_dimension_numbers<[1], [0], [0], [1], [0, 0, 1, 1], [], []>} : vector<128x32xbf16>, vector<32x128xbf16>, vector<128x128xf32> -> vector<128x128xf32>
    %4 = vector.shape_cast %3 : vector<128x128xf32> to vector<8x16x128xf32>
    %c0_4 = arith.constant 0 : index
    %c0_5 = arith.constant 0 : index
    %5 = vector.load %arg2[%c0_4, %c0_5] : memref<8x16xf32, #tpu.memory_space<vmem>>, vector<8x16xf32>
    %6 = vector.shape_cast %5 : vector<8x16xf32> to vector<8x16x1xf32>
    %7 = vector.broadcast %6 : vector<8x16x1xf32> to vector<8x16x128xf32>
    %8 = arith.mulf %7, %4 : vector<8x16x128xf32>
    %cst_6 = arith.constant dense<0.000000e+00> : vector<8x128xf32>
    %9 = vector.multi_reduction <add>, %8, %cst_6 [1] : vector<8x16x128xf32> to vector<8x128xf32>
    %c0_7 = arith.constant 0 : index
    %c0_8 = arith.constant 0 : index
    %10 = vector.load %arg4[%c0_7, %c0_8] : memref<1x128xf32, #tpu.memory_space<vmem>>, vector<1x128xf32>
    %11 = vector.broadcast %10 : vector<1x128xf32> to vector<8x128xf32>
    %12 = arith.addf %9, %11 : vector<8x128xf32>
    %13 = arith.mulf %12, %12 : vector<8x128xf32>
    %cst_9 = arith.constant dense<0.000000e+00> : vector<8xf32>
    %14 = vector.multi_reduction <add>, %13, %cst_9 [1] : vector<8x128xf32> to vector<8xf32>
    %15 = vector.shape_cast %14 : vector<8xf32> to vector<8x1xf32>
    %cst_10 = arith.constant 9.99999993E-9 : f32
    %16 = vector.broadcast %cst_10 : f32 to vector<8x1xf32>
    %17 = arith.addf %15, %16 : vector<8x1xf32>
    %18 = math.rsqrt %17 : vector<8x1xf32>
    %19 = vector.broadcast %18 : vector<8x1xf32> to vector<8x128xf32>
    %20 = arith.mulf %12, %19 : vector<8x128xf32>
    %c0_11 = arith.constant 0 : index
    %c0_12 = arith.constant 0 : index
    %21 = vector.load %arg5[%c0_11, %c0_12] : memref<8x128xf32, #tpu.memory_space<vmem>>, vector<8x128xf32>
    tpu.vector_store %arg5[%c0_11, %c0_12], %20 {strides = array<i32>} : memref<8x128xf32, #tpu.memory_space<vmem>>, vector<8x128xf32>,
    return
  }
  func.func @transform_0(%arg0: i32) -> (i32, i32, i32) {
    %c0_i32 = arith.constant 0 : i32
    %c0_i32_0 = arith.constant 0 : i32
    %c0_i32_1 = arith.constant 0 : i32
    return %arg0, %c0_i32, %c0_i32_0 : i32, i32, i32
  }
  func.func @transform_1(%arg0: i32) -> (i32, i32) {
    %c0_i32 = arith.constant 0 : i32
    %c0_i32_0 = arith.constant 0 : i32
    return %arg0, %c0_i32 : i32, i32
  }
  func.func @transform_2(%arg0: i32) -> (i32, i32) {
    %c0_i32 = arith.constant 0 : i32
    %c0_i32_0 = arith.constant 0 : i32
    %c0_i32_1 = arith.constant 0 : i32
    return %c0_i32, %c0_i32_0 : i32, i32
  }
  func.func @transform_3(%arg0: i32) -> (i32, i32) {
    %c0_i32 = arith.constant 0 : i32
    %c0_i32_0 = arith.constant 0 : i32
    %c0_i32_1 = arith.constant 0 : i32
    return %c0_i32, %c0_i32_0 : i32, i32
  }
  func.func @transform_4(%arg0: i32) -> (i32, i32) {
    %c0_i32 = arith.constant 0 : i32
    %c0_i32_0 = arith.constant 0 : i32
    return %arg0, %c0_i32 : i32, i32
  }
}

</mosaic_0001>

<bundles_post_ra>
// kernel: tpu_custom_call.1
= control target key start
LH: loop header
LB: loop body
LE: loop exit
PB: predicated region body
PF: predicated region fallthrough
CT: control target
= control target key end

     0   :  { %9 = vsyncpa [#allocation3], 0  ;;  %s815_s0 = inlined_call_operand.hbm [shape: bf16[8,16,32], index: 0, kind: input, shape index: {}]   ;;  %s816_s1 = inlined_call_operand.hbm [shape: f32[8,16], index: 1, kind: input, shape index: {}]   ;;  %s817_s2 = inlined_call_operand.hbm [shape: bf16[32,128], index: 2, kind: input, shape index: {}]   ;;  %s818_s3 = inlined_call_operand.vmem [shape: f32[1,128], index: 3, kind: input, shape index: {}]   ;;  %s819_s4 = inlined_call_operand.hbm [shape: f32[8,128], index: 4, kind: output, shape index: {}]  }
   0x1   :  { %10 = vsyncpa [#allocation6], 0 }
   0x2   :  { %11 = vsyncpa [#allocation4], 0  ;;  %s699_s15 = smov [#allocation5]   ;;  %s700_s17 = smov [#allocation2]  }
   0x3   :  { %s30_s16 = sshll.u32 %s699_s15, 4  ;;  %s17_s18 = sshll.u32 %s700_s17, 4  ;;  %s31_s16 = int_to_ptr.vmem [resolvable:$true] %s30_s16  ;;  %s730_s18 = int_to_ptr.vmem [resolvable:$true] %s17_s18 }
   0x4   :  { %s605_s21 = scalar_lea.hbm %s816_s1, 128 }
   0x5   :  { %p606_p0 = scmp.ne.s32.totalorder %s816_s1, %s605_s21  ;;  %p609_p1 = scmp.lt.u32.totalorder %s605_s21, %s816_s1 }
   0x7   :  { %p611_p2 = pnand %p609_p1, %p606_p0 }
   0x9   :  { %614 = shalt.err (!%p611_p2)
}
   0xa   :  { %s615_s26 = scalar_lea.vmem %s31_s16, 128  ;;  %p620_p4 = scmp.lt.s32.totalorder %s31_s16, %s31_s16 }
   0xb   :  { %p616_p3 = scmp.ne.s32.totalorder %s31_s16, %s615_s26  ;;  %p621_p5 = scmp.lt.s32.totalorder %s615_s26, %s615_s26 }
   0xd   :  { %p622_p6 = por %p621_p5, %p620_p4 }
   0xf   :  { %p623_p7 = pnand %p622_p6, %p616_p3 }
  0x11   :  { %626 = shalt.err (!%p623_p7)
}
  0x12   :  { %33 = dma.hbm_to_vmem [thread:$0]  %s816_s1, 128, %s31_s16, [#allocation6]  }
  0x13   :  { %s627_s5 = scalar_lea.hbm %s815_s0, 1024 }
  0x14   :  { %p628_p8 = scmp.ne.s32.totalorder %s815_s0, %s627_s5  ;;  %p631_p9 = scmp.lt.u32.totalorder %s627_s5, %s815_s0 }
  0x16   :  { %p633_p10 = pnand %p631_p9, %p628_p8 }
  0x18   :  { %636 = shalt.err (!%p633_p10)
}
  0x19   :  { %s637_s10 = scalar_lea.vmem %s730_s18, 1024  ;;  %p642_p12 = scmp.lt.s32.totalorder %s730_s18, %s730_s18 }
  0x1a   :  { %p638_p11 = scmp.ne.s32.totalorder %s730_s18, %s637_s10  ;;  %p643_p13 = scmp.lt.s32.totalorder %s637_s10, %s637_s10 }
  0x1c   :  { %p644_p0 = por %p643_p13, %p642_p12 }
  0x1e   :  { %p645_p1 = pnand %p644_p0, %p638_p11 }
  0x20   :  { %648 = shalt.err (!%p645_p1)
}
  0x21   :  { %s701_s1 = smov 64   ;;  %s702_s11 = smov 4  }
  0x22   :  { %23 = dma.hbm_to_vmem [thread:$0]  %s815_s0, 1024, %s730_s18, [#allocation3], %s701_s1, %s701_s1, %s702_s11  }
  0x23   :  { %s703_s14 = smov [#allocation7]   ;;  %s649_s19 = scalar_lea.hbm %s817_s2, 256 }
  0x24   :  { %s39_s15 = sshll.u32 %s703_s14, 4  ;;  %p650_p2 = scmp.ne.s32.totalorder %s817_s2, %s649_s19  ;;  %s40_s15 = int_to_ptr.vmem [resolvable:$true] %s39_s15 }
  0x25   :  { %p653_p3 = scmp.lt.u32.totalorder %s649_s19, %s817_s2 }
  0x27   :  { %p655_p4 = pnand %p653_p3, %p650_p2 }
  0x29   :  { %658 = shalt.err (!%p655_p4)
}
  0x2a   :  { %s659_s24 = scalar_lea.vmem %s40_s15, 256  ;;  %p664_p6 = scmp.lt.s32.totalorder %s40_s15, %s40_s15 }
  0x2b   :  { %p660_p5 = scmp.ne.s32.totalorder %s40_s15, %s659_s24  ;;  %p665_p7 = scmp.lt.s32.totalorder %s659_s24, %s659_s24 }
  0x2d   :  { %p666_p8 = por %p665_p7, %p664_p6 }
  0x2f   :  { %p667_p9 = pnand %p666_p8, %p660_p5 }
  0x31   :  { %670 = shalt.err (!%p667_p9)
}
  0x32   :  { %45 = dma.hbm_to_vmem [thread:$0]  %s817_s2, 256, %s40_s15, [#allocation6], %s701_s1, %s701_s1, %s702_s11  }
  0x33   :  { %693 = dma.done.wait [#allocation3], 1024  }
  0x34   :  { %694 = vsyncadd [#allocation3], 4294966272 }
  0x35   :  { %695 = dma.done.wait [#allocation6], 384  }
  0x36   :  { %696 = vsyncadd [#allocation6], 4294966912  ;;  %v253_v0 = vlaneseq  ;;  %v593_v1 = vld [vmem:[#allocation7] sm:$0xff]   ;;  %v594_v2 = vld [vmem:[#allocation7 + $0x8] sm:$0xff]   ;;  %vm130_vm0 = vcmask 261120   ;;  %vm445_vm1 = vcmask 1041409  }
  0x37   :  { %563 = vmatprep.subr.bf16.mxu0 %v593_v1  ;;  %583 = vmatprep.subr.bf16.mxu1 %v593_v1  ;;  %v595_v3 = vld [vmem:[#allocation2] sm:$0xff]   ;;  %v597_v6 = vld [vmem:[#allocation2 + $0x8] sm:$0xff]   ;;  %v599_v8 = vld [vmem:[#allocation2 + $0x10] sm:$0xff]   ;;  %vm448_vm2 = vcmask 1042434   ;;  %vm451_vm3 = vcmask 1043459   ;;  %vm454_vm4 = vcmask 1044484  }
  0x38   :  { %v254_v4 = vshrl.u32 %v253_v0, 7  ;;  %564 = vmatpush3.bf16.msra.mxu0 %v593_v1  ;;  %585 = vmatpush3.bf16.msra.mxu1 %v593_v1  ;;  %v596_v5 = vld [vmem:[#allocation2 + $0x20] sm:$0xff]   ;;  %v598_v7 = vld [vmem:[#allocation2 + $0x28] sm:$0xff]   ;;  %v600_v10 = vld [vmem:[#allocation2 + $0x30] sm:$0xff]   ;;  %vm457_vm5 = vcmask 1045509   ;;  %vm460_vm6 = vcmask 1046534  }
  0x39   :  { %565 = vmatprep.subr.bf16.mxu0 %v594_v2  ;;  %584 = vmatprep.subr.bf16.mxu1 %v594_v2  ;;  %v252_v12 = vld [vmem:[#allocation5] sm:$0xff]  ;;  %v601_v16 = vld [vmem:[#allocation2 + $0x18] sm:$0xff]   ;;  %vm463_vm7 = vcmask 1047559  }
  0x3a   :  { %567 = vmatprep.mubr.msk.bf16.mxu0 %vm130_vm0, %v595_v3  ;;  %575 = vmatprep.mubr.msk.bf16.mxu1 %vm130_vm0, %v596_v5  ;;  %v277_v9 = vsub.s32 2, %v254_v4  ;;  %v266_v11 = vsub.s32 1, %v254_v4  ;;  %v255_v15 = vsub.s32 0, %v254_v4  ;;  %v602_v17 = vld [vmem:[#allocation2 + $0x38] sm:$0xff]   ;;  %v288_v19 = vsub.s32 3, %v254_v4 }
  0x3b   :  { %v299_v21 = vsub.s32 4, %v254_v4  ;;  %v310_v23 = vsub.s32 5, %v254_v4  ;;  %v321_v25 = vsub.s32 6, %v254_v4  ;;  %v332_v27 = vsub.s32 7, %v254_v4 }
  0x3c   :  { %566 = vmatpush3.bf16.msra.mxu0 %v594_v2  ;;  %586 = vmatpush3.bf16.msra.mxu1 %v594_v2  ;;  %v278_v13 = vrot.slane %v252_v12, %v277_v9  ;;  %v267_v14 = vrot.slane %v252_v12, %v266_v11  ;;  %v256_v18 = vrot.slane %v252_v12, %v255_v15 }
  0x3d   :  { %v289_v20 = vrot.slane %v252_v12, %v288_v19  ;;  %v300_v22 = vrot.slane %v252_v12, %v299_v21  ;;  %v311_v24 = vrot.slane %v252_v12, %v310_v23  ;;  %v322_v26 = vrot.slane %v252_v12, %v321_v25 }
  0x3e   :  { %280 = vbcast.lane.b32.xlu1 %v278_v13, 256  ;;  %269 = vbcast.lane.b32.xlu0 %v267_v14, 256  ;;  %v333_v28 = vrot.slane %v252_v12, %v332_v27 }
  0x3f   :  { %568 = vmatmul.mubr.msk.bf16.vlgmr.msra.gmra.mrb[0].mxu0 %vm130_vm0, %v597_v6  ;;  %576 = vmatmul.mubr.msk.bf16.vlgmr.msra.gmra.mrb[0].mxu1 %vm130_vm0, %v598_v7 }
  0x40   :  { %571 = vmatprep.mubr.msk.bf16.mxu0 %vm130_vm0, %v599_v8  ;;  %579 = vmatprep.mubr.msk.bf16.mxu1 %vm130_vm0, %v600_v10 }
  0x42   :  { %284 = vbcast.lane.b32.xlu1 %v278_v13, 264  ;;  %273 = vbcast.lane.b32.xlu0 %v267_v14, 264 }
  0x46   :  { %262 = vbcast.lane.b32.xlu1 %v256_v18, 264  ;;  %258 = vbcast.lane.b32.xlu0 %v256_v18, 256 }
  0x47   :  { %572 = vmatmul.mubr.msk.bf16.gmra.mrb[4].mxu0 %vm130_vm0, %v601_v16  ;;  %580 = vmatmul.mubr.msk.bf16.gmra.mrb[4].mxu1 %vm130_vm0, %v602_v17 }
  0x4a   :  { %295 = vbcast.lane.b32.xlu1 %v289_v20, 264  ;;  %291 = vbcast.lane.b32.xlu0 %v289_v20, 256 }
  0x4e   :  { %306 = vbcast.lane.b32.xlu1 %v300_v22, 264  ;;  %302 = vbcast.lane.b32.xlu0 %v300_v22, 256 }
  0x52   :  { %317 = vbcast.lane.b32.xlu1 %v311_v24, 264  ;;  %313 = vbcast.lane.b32.xlu0 %v311_v24, 256 }
  0x56   :  { %328 = vbcast.lane.b32.xlu1 %v322_v26, 264  ;;  %324 = vbcast.lane.b32.xlu0 %v322_v26, 256 }
  0x5a   :  { %339 = vbcast.lane.b32.xlu1 %v333_v28, 264  ;;  %335 = vbcast.lane.b32.xlu0 %v333_v28, 256 }
  0xb0   :  { %v281_v29 = vpop.permute.xlu1 %280  ;;  %v270_v30 = vpop.permute.xlu0 %269 }
  0xb4   :  { %v285_v31 = vpop.permute.xlu1 %284  ;;  %v274_v32 = vpop.permute.xlu0 %273 }
  0xb8   :  { %v263_v33 = vpop.permute.xlu1 %262  ;;  %v259_v34 = vpop.permute.xlu0 %258 }
  0xbc   :  { %v296_v35 = vpop.permute.xlu1 %295  ;;  %v292_v36 = vpop.permute.xlu0 %291 }
  0xc0   :  { %v307_v37 = vpop.permute.xlu1 %306  ;;  %v303_v38 = vpop.permute.xlu0 %302 }
  0xc4   :  { %v318_v39 = vpop.permute.xlu1 %317  ;;  %v314_v40 = vpop.permute.xlu0 %313 }
  0xc8   :  { %v329_v41 = vpop.permute.xlu1 %328  ;;  %v325_v42 = vpop.permute.xlu0 %324 }
  0xcc   :  { %v336_v63 = vpop.permute.xlu0 %335  ;;  %v340_v2 = vpop.permute.xlu1 %339 }
 0x112   :  { %v569_v43 = vpop.f32.mrb[0].mxu0  ;;  %v577_v44 = vpop.f32.mrb[0].mxu1 }
 0x113   :  { %v189_v45 = vpop.f32.mrb[1].mxu0  ;;  %v221_v46 = vpop.f32.mrb[1].mxu1  ;;  %v351_v47 = vmul.f32 %v577_v44, %v314_v40  ;;  %v343_v51 = vmul.f32 %v569_v43, %v270_v30 }
 0x114   :  { %v349_v48 = vmul.f32 %v303_v38, %v221_v46  ;;  %v570_v49 = vpop.f32.mrb[2].mxu0  ;;  %v578_v50 = vpop.f32.mrb[2].mxu1  ;;  %v341_v56 = vmul.f32 %v259_v34, %v189_v45 }
 0x115   :  { %v344_v52 = vmul.f32 %v570_v49, %v274_v32  ;;  %v352_v53 = vmul.f32 %v578_v50, %v318_v39  ;;  %v192_v54 = vpop.f32.mrb[3].mxu0  ;;  %v224_v55 = vpop.f32.mrb[3].mxu1 }
 0x116   :  { %v342_v57 = vmul.f32 %v263_v33, %v192_v54  ;;  %v350_v58 = vmul.f32 %v307_v37, %v224_v55 }
 0x117   :  { %v364_v59 = vadd.f32 %v344_v52, %v343_v51  ;;  %v392_v60 = vadd.f32 %v352_v53, %v351_v47 }
 0x118   :  { %v357_v61 = vadd.f32 %v342_v57, %v341_v56  ;;  %v385_v62 = vadd.f32 %v350_v58, %v349_v48 }
 0x119   :  { %v365_v0 = vrot.slane %v364_v59, 4  ;;  %v393_v1 = vrot.slane %v392_v60, 4 }
 0x11a   :  { %v358_v3 = vrot.slane %v357_v61, 4  ;;  %v386_v4 = vrot.slane %v385_v62, 4  ;;  %v573_v5 = vpop.f32.mrb[4].mxu0  ;;  %v581_v6 = vpop.f32.mrb[4].mxu1 }
 0x11b   :  { %v366_v7 = vadd.f32 %v365_v0, %v364_v59  ;;  %v394_v8 = vadd.f32 %v393_v1, %v392_v60  ;;  %v347_v9 = vmul.f32 %v573_v5, %v292_v36  ;;  %v205_v10 = vpop.f32.mrb[5].mxu0  ;;  %v237_v11 = vpop.f32.mrb[5].mxu1  ;;  %v355_v12 = vmul.f32 %v581_v6, %v336_v63 }
 0x11c   :  { %v359_v13 = vadd.f32 %v358_v3, %v357_v61  ;;  %v387_v14 = vadd.f32 %v386_v4, %v385_v62  ;;  %v345_v15 = vmul.f32 %v281_v29, %v205_v10  ;;  %v353_v16 = vmul.f32 %v325_v42, %v237_v11  ;;  %v574_v17 = vpop.f32.mrb[6].mxu0  ;;  %v582_v18 = vpop.f32.mrb[6].mxu1 }
 0x11d   :  { %v367_v19 = vrot.slane %v366_v7, 2  ;;  %v395_v20 = vrot.slane %v394_v8, 2  ;;  %v348_v21 = vmul.f32 %v574_v17, %v296_v35  ;;  %v356_v22 = vmul.f32 %v582_v18, %v340_v2  ;;  %v208_v23 = vpop.f32.mrb[7].mxu0  ;;  %v240_v24 = vpop.f32.mrb[7].mxu1 }
 0x11e   :  { %v360_v25 = vrot.slane %v359_v13, 2  ;;  %v388_v26 = vrot.slane %v387_v14, 2  ;;  %v346_v27 = vmul.f32 %v285_v31, %v208_v23  ;;  %v354_v28 = vmul.f32 %v329_v41, %v240_v24  ;;  %v552_v31 = vld [vmem:[%s818_s3] ss:$0 sm:$0xff]  ;;  %s704_s3 = smov [#allocation8]  }
 0x11f   :  { %v368_v30 = vadd.f32 %v367_v19, %v366_v7  ;;  %v378_v32 = vadd.f32 %v348_v21, %v347_v9  ;;  %v406_v33 = vadd.f32 %v356_v22, %v355_v12  ;;  %v396_v39 = vadd.f32 %v395_v20, %v394_v8  ;;  %s524_s26 = sshll.u32 %s704_s3, 4  ;;  %s525_s26 = int_to_ptr.vmem [resolvable:$true] %s524_s26 }
 0x120   :  { %v361_v34 = vadd.f32 %v360_v25, %v359_v13  ;;  %v389_v36 = vadd.f32 %v388_v26, %v387_v14  ;;  %v371_v37 = vadd.f32 %v346_v27, %v345_v15  ;;  %v399_v29 = vadd.f32 %v354_v28, %v353_v16  ;;  %s671_s27 = scalar_lea.vmem %s525_s26, 128  ;;  %p676_p11 = scmp.lt.s32.totalorder %s525_s26, %s525_s26 }
 0x121   :  { %v369_v38 = vrot.slane %v368_v30, 1  ;;  %v379_v40 = vrot.slane %v378_v32, 4  ;;  %v407_v42 = vrot.slane %v406_v33, 4  ;;  %v397_v50 = vrot.slane %v396_v39, 1  ;;  %p672_p10 = scmp.ne.s32.totalorder %s525_s26, %s671_s27  ;;  %p677_p12 = scmp.lt.s32.totalorder %s671_s27, %s671_s27 }
 0x122   :  { %v372_v43 = vrot.slane %v371_v37, 4  ;;  %v400_v35 = vrot.slane %v399_v29, 4  ;;  %v362_v45 = vrot.slane %v361_v34, 1  ;;  %v390_v41 = vrot.slane %v389_v36, 1 }
 0x123   :  { %v370_v44 = vadd.f32 %v369_v38, %v368_v30  ;;  %v380_v46 = vadd.f32 %v379_v40, %v378_v32  ;;  %v408_v47 = vadd.f32 %v407_v42, %v406_v33  ;;  %v398_v62 = vadd.f32 %v397_v50, %v396_v39  ;;  %p678_p13 = por %p677_p12, %p676_p11 }
 0x124   :  { %v373_v48 = vadd.f32 %v372_v43, %v371_v37  ;;  %v401_v49 = vadd.f32 %v400_v35, %v399_v29  ;;  %v363_v56 = vadd.f32 %v362_v45, %v361_v34  ;;  %v391_v59 = vadd.f32 %v390_v41, %v389_v36 }
 0x125   :  { %v381_v51 = vrot.slane %v380_v46, 2  ;;  %v409_v52 = vrot.slane %v408_v47, 2  ;;  %v784_v55 = vadd.f32 %v552_v31, %v370_v44  ;;  %v425_v10 = vadd.f32 %v552_v31, %v398_v62  ;;  %p679_p0 = pnand %p678_p13, %p672_p10 }
 0x126   :  { %v374_v53 = vrot.slane %v373_v48, 2  ;;  %v402_v54 = vrot.slane %v401_v49, 2  ;;  %v420_v4 = vadd.f32 %v552_v31, %v363_v56  ;;  %v424_v7 = vadd.f32 %v552_v31, %v391_v59 }
 0x127   :  { %v382_v57 = vadd.f32 %v381_v51, %v380_v46  ;;  %v410_v58 = vadd.f32 %v409_v52, %v408_v47  ;;  %v429_v3 = vmul.f32 %v784_v55, %v784_v55  ;;  %v433_v20 = vmul.f32 %v425_v10, %v425_v10 }
 0x128   :  { %v375_v60 = vadd.f32 %v374_v53, %v373_v48  ;;  %v403_v61 = vadd.f32 %v402_v54, %v401_v49  ;;  %v428_v15 = vmul.f32 %v420_v4, %v420_v4  ;;  %v432_v19 = vmul.f32 %v424_v7, %v424_v7 }
 0x129   :  { %v383_v63 = vrot.slane %v382_v57, 1  ;;  %v411_v0 = vrot.slane %v410_v58, 1  ;;  %v444_v14 = vrot.slane %v429_v3, 7  ;;  %v456_v30 = vrot.slane %v433_v20, 3 }
 0x12a   :  { %v376_v1 = vrot.slane %v375_v60, 1  ;;  %v404_v2 = vrot.slane %v403_v61, 1  ;;  %v453_v27 = vrot.slane %v432_v19, 4 }
 0x12b   :  { %v384_v5 = vadd.f32 %v383_v63, %v382_v57  ;;  %v412_v6 = vadd.f32 %v411_v0, %v410_v58  ;;  %v446_v25 = vsel %vm445_vm1, %v444_v14, %v428_v15 }
 0x12c   :  { %v377_v8 = vadd.f32 %v376_v1, %v375_v60  ;;  %v405_v9 = vadd.f32 %v404_v2, %v403_v61 }
 0x12d   :  { %v423_v11 = vadd.f32 %v552_v31, %v384_v5  ;;  %v427_v17 = vadd.f32 %v552_v31, %v412_v6 }
 0x12e   :  { %v422_v12 = vadd.f32 %v552_v31, %v377_v8  ;;  %v426_v13 = vadd.f32 %v552_v31, %v405_v9 }
 0x12f   :  { %v431_v16 = vmul.f32 %v423_v11, %v423_v11  ;;  %v435_v24 = vmul.f32 %v427_v17, %v427_v17 }
 0x130   :  { %v430_v18 = vmul.f32 %v422_v12, %v422_v12  ;;  %v434_v22 = vmul.f32 %v426_v13, %v426_v13 }
 0x131   :  { %v450_v23 = vrot.slane %v431_v16, 5  ;;  %v462_v36 = vrot.slane %v435_v24, 1 }
 0x132   :  { %v447_v21 = vrot.slane %v430_v18, 6  ;;  %v459_v33 = vrot.slane %v434_v22, 2 }
 0x134   :  { %v449_v26 = vsel %vm448_vm2, %v447_v21, %v446_v25 }
 0x135   :  { %v452_v28 = vsel %vm451_vm3, %v450_v23, %v449_v26 }
 0x136   :  { %v455_v32 = vsel %vm454_vm4, %v453_v27, %v452_v28 }
 0x137   :  { %v458_v34 = vsel %vm457_vm5, %v456_v30, %v455_v32 }
 0x138   :  { %v461_v37 = vsel %vm460_vm6, %v459_v33, %v458_v34 }
 0x139   :  { %v464_v29 = vsel %vm463_vm7, %v462_v36, %v461_v37 }
 0x13a   :  { %466 = vadd.xlane.f32.xlu0 %v464_v29 }
 0x1c7   :  { %v467_v38 = vpop.xlane.xlu0 %466 }
 0x1c8   :  { %v468_v39 = vadd.f32 1e-08, %v467_v38 }
 0x1ca   :  { %603 = vrsqrt.f32 %v468_v39 }
 0x1d4   :  { %v604_v40 = vpop.eup %603 }
 0x1d5   :  { %v471_v42 = vrot.slane %v604_v40, 1  ;;  %v472_v43 = vrot.slane %v604_v40, 2  ;;  %v473_v35 = vrot.slane %v604_v40, 3  ;;  %v474_v44 = vrot.slane %v604_v40, 4 }
 0x1d6   :  { %v475_v45 = vrot.slane %v604_v40, 5  ;;  %v476_v46 = vrot.slane %v604_v40, 6  ;;  %v477_v47 = vrot.slane %v604_v40, 7  ;;  %v486_v50 = vmul.f32 %v604_v40, %v420_v4 }
 0x1d7   :  { %v487_v31 = vmul.f32 %v471_v42, %v784_v55  ;;  %v488_v41 = vmul.f32 %v472_v43, %v422_v12  ;;  %v489_v48 = vmul.f32 %v473_v35, %v423_v11  ;;  %v490_v49 = vmul.f32 %v474_v44, %v424_v7 }
 0x1d8   :  { %v491_v51 = vmul.f32 %v475_v45, %v425_v10  ;;  %v492_v54 = vmul.f32 %v476_v46, %v426_v13  ;;  %v493_v56 = vmul.f32 %v477_v47, %v427_v17 }
 0x1d9   :  { %v502_v52 = vrot.slane %v487_v31, 7  ;;  %v504_v53 = vrot.slane %v488_v41, 6  ;;  %v506_v58 = vrot.slane %v489_v48, 5  ;;  %v508_v60 = vrot.slane %v490_v49, 4 }
 0x1da   :  { %v510_v62 = vrot.slane %v491_v51, 3  ;;  %v512_v63 = vrot.slane %v492_v54, 2  ;;  %v514_v1 = vrot.slane %v493_v56, 1 }
 0x1db   :  { %v503_v57 = vsel %vm445_vm1, %v502_v52, %v486_v50 }
 0x1dc   :  { %v505_v59 = vsel %vm448_vm2, %v504_v53, %v503_v57 }
 0x1dd   :  { %v507_v61 = vsel %vm451_vm3, %v506_v58, %v505_v59 }
 0x1de   :  { %v509_v55 = vsel %vm454_vm4, %v508_v60, %v507_v61 }
 0x1df   :  { %v511_v0 = vsel %vm457_vm5, %v510_v62, %v509_v55 }
 0x1e0   :  { %v513_v2 = vsel %vm460_vm6, %v512_v63, %v511_v0 }
 0x1e1   :  { %v515_v3 = vsel %vm463_vm7, %v514_v1, %v513_v2 }
 0x1e2   :  { %517 = vst [vmem:[#allocation8] sm:$0xff] %v515_v3 }
 0x1e3   :  { %682 = shalt.err (!%p679_p0)
}
 0x1e4   :  { %s683_s30 = scalar_lea.hbm %s819_s4, 128 }
 0x1e5   :  { %p684_p1 = scmp.ne.s32.totalorder %s819_s4, %s683_s30  ;;  %p687_p2 = scmp.lt.u32.totalorder %s683_s30, %s819_s4 }
 0x1e7   :  { %p689_p3 = pnand %p687_p2, %p684_p1 }
 0x1e9   :  { %692 = shalt.err (!%p689_p3)
}
 0x1ea   :  { %527 = dma.vmem_to_hbm [thread:$0]  %s525_s26, 128, %s819_s4, [#allocation4]  }
 0x1eb   :  { %697 = dma.done.wait [#allocation4], 128  }
 0x1ec   :  { %698 = vsyncadd [#allocation4], 4294967168 }
 0x1ed   :  { %531 = vsyncpa [#allocation3], 1 }
 0x1ee   :  { %532 = vsyncpa [#allocation6], 1 }
 0x1ef   :  { %533 = vsyncpa [#allocation4], 1 }

</bundles_post_ra>
